<compile_context>
chip_gen: v7x
topology: tpu7x:2x2x1
jax: 0.10.0
libtpu: 0.0.40
codegen_flags: <defaults>
</compile_context>

<pallas_src>
import jax
import jax.numpy as jnp
from jax.experimental import pallas as pl
from jax.experimental.pallas import tpu as pltpu

STATE_SIZE = 8
HIDDEN = 64


def critic_kernel(xT_ref, w1_ref, b1_ref, w2_ref, b2_ref, o_ref):
    # xT_ref: (STATE_SIZE, TILE_B)  -- batch on lanes (dense)
    # w1_ref: (HIDDEN, STATE_SIZE)  -- PyTorch fc1.weight layout
    # b1_ref: (HIDDEN, 1)
    # w2_ref: (1, HIDDEN)           -- PyTorch fc2.weight layout
    # b2_ref: (1, 1)
    # o_ref : (1, TILE_B)           -- lane-dense output slab
    h = jnp.dot(w1_ref[...], xT_ref[...],
                preferred_element_type=jnp.float32)        # (HIDDEN, TILE_B) on MXU
    h = jnp.maximum(h + b1_ref[...], 0.0)                  # bias broadcast + ReLU (VPU)
    v = jnp.dot(w2_ref[...], h,
                preferred_element_type=jnp.float32)        # (1, TILE_B), lane-dense
    o_ref[...] = v + b2_ref[...]


def critic_forward(state, w1, b1, w2, b2, *, tile_b=2048):
    """state: (B, STATE_SIZE) f32 -> value: (B, 1) f32.

    Weights are in PyTorch layout: w1 (HIDDEN, STATE_SIZE), b1 (HIDDEN,),
    w2 (1, HIDDEN), b2 (1,).  Computes relu(state @ w1.T + b1) @ w2.T + b2.
    """
    B = state.shape[0]

    # Tile the batch: multiple of 128 lanes, but don't over-tile tiny batches.
    tile_b = max(128, min(tile_b, pl.cdiv(B, 128) * 128))
    num_tiles = pl.cdiv(B, tile_b)
    b_pad = num_tiles * tile_b

    # Batch-on-lane layout: transpose + pad once in the wrapper (cheap XLA ops on
    # a tiny (B, 8) array); keeps the kernel's output slab lane-dense.
    xT = state.T                                           # (STATE_SIZE, B)
    if b_pad != B:
        xT = jnp.pad(xT, ((0, 0), (0, b_pad - B)))

    b1c = b1.reshape(HIDDEN, 1)
    b2c = b2.reshape(1, 1)

    cost = pl.CostEstimate(
        flops=2 * b_pad * (STATE_SIZE * HIDDEN + HIDDEN),
        transcendentals=0,
        bytes_accessed=4 * (b_pad * STATE_SIZE + STATE_SIZE * HIDDEN
                            + 2 * HIDDEN + 1 + b_pad),
    )

    out = pl.pallas_call(
        critic_kernel,
        out_shape=jax.ShapeDtypeStruct((1, b_pad), jnp.float32),
        grid=(num_tiles,),
        in_specs=[
            pl.BlockSpec((STATE_SIZE, tile_b), lambda i: (0, i)),  # stream batch tiles
            pl.BlockSpec(w1.shape, lambda i: (0, 0)),              # weights stay resident
            pl.BlockSpec((HIDDEN, 1), lambda i: (0, 0)),
            pl.BlockSpec(w2.shape, lambda i: (0, 0)),
            pl.BlockSpec((1, 1), lambda i: (0, 0)),
        ],
        out_specs=pl.BlockSpec((1, tile_b), lambda i: (0, i)),
        compiler_params=pltpu.CompilerParams(
            dimension_semantics=("parallel",),   # shard batch tiles across TCs (v7x)
        ),
        cost_estimate=cost,
    )(xT, w1, b1c, w2, b2c)

    return out[0, :B].reshape(B, 1)


def init_params(key, state_size=STATE_SIZE, hidden=HIDDEN):
    """Deterministic init mimicking nn.Linear's U(-1/sqrt(fan_in), 1/sqrt(fan_in)),
    stored in PyTorch (out_features, in_features) layout."""
    k1, k2, k3, k4 = jax.random.split(key, 4)
    bound1 = 1.0 / jnp.sqrt(state_size)
    bound2 = 1.0 / jnp.sqrt(hidden)
    w1 = jax.random.uniform(k1, (hidden, state_size), jnp.float32, -bound1, bound1)  # fc1.weight
    b1 = jax.random.uniform(k2, (hidden,), jnp.float32, -bound1, bound1)             # fc1.bias
    w2 = jax.random.uniform(k3, (1, hidden), jnp.float32, -bound2, bound2)           # fc2.weight
    b2 = jax.random.uniform(k4, (1,), jnp.float32, -bound2, bound2)                  # fc2.bias
    return w1, b1, w2, b2


def _ref_forward(state, w1, b1, w2, b2):
    # Plain-JAX reference, identical math to the PyTorch module.
    return jnp.maximum(state @ w1.T + b1, 0.0) @ w2.T + b2


if __name__ == "__main__":
    key = jax.random.PRNGKey(0)
    k_params, k_s1, k_s2 = jax.random.split(key, 3)
    w1, b1, w2, b2 = init_params(k_params)

    # Small batch (single tile, heavy padding path).
    batch = 8
    state = jax.random.normal(k_s1, (batch, STATE_SIZE), jnp.float32)
    value = jax.block_until_ready(critic_forward(state, w1, b1, w2, b2))
    ref = _ref_forward(state, w1, b1, w2, b2)
    assert value.shape == (batch, 1)
    assert jnp.allclose(value, ref, atol=1e-5, rtol=1e-5)

    # Multi-tile grid + non-multiple-of-tile batch (exercises padding + streaming).
    batch2 = 300
    state2 = jax.random.normal(k_s2, (batch2, STATE_SIZE), jnp.float32)
    value2 = jax.block_until_ready(critic_forward(state2, w1, b1, w2, b2, tile_b=128))
    ref2 = _ref_forward(state2, w1, b1, w2, b2)
    assert value2.shape == (batch2, 1)
    assert jnp.allclose(value2, ref2, atol=1e-5, rtol=1e-5)

    print("KERNEL_OK")
</pallas_src>

<mosaic_0001>
module attributes {stable_mosaic.version = 11 : i64} {
  func.func @critic_kernel(%arg0: i32, %arg1: memref<8x128xf32, #tpu.memory_space<vmem>>, %arg2: memref<64x8xf32, #tpu.memory_space<vmem>>, %arg3: memref<64x1xf32, #tpu.memory_space<vmem>>, %arg4: memref<1x64xf32, #tpu.memory_space<vmem>>, %arg5: memref<1x1xf32, #tpu.memory_space<vmem>>, %arg6: memref<1x128xf32, #tpu.memory_space<vmem>>) attributes {dimension_semantics = [#tpu.dimension_semantics<parallel>], iteration_bounds = array<i64: 1>, scalar_prefetch = 0 : i64, scratch_operands = 0 : i64, tpu.core_type = #tpu.core_type<tc>, window_params = [{transform_indices = @transform_0, window_bounds = array<i64: 8, 128>}, {pipeline_mode = #tpu.pipeline_mode<synchronous>, transform_indices = @transform_1, window_bounds = array<i64: 64, 8>}, {pipeline_mode = #tpu.pipeline_mode<synchronous>, transform_indices = @transform_2, window_bounds = array<i64: 64, 1>}, {pipeline_mode = #tpu.pipeline_mode<synchronous>, transform_indices = @transform_3, window_bounds = array<i64: 1, 64>}, {pipeline_mode = #tpu.pipeline_mode<synchronous>, transform_indices = @transform_4, window_bounds = array<i64: 1, 1>}, {transform_indices = @transform_5, window_bounds = array<i64: 1, 128>}]} {
    %c0 = arith.constant 0 : index
    %c0_0 = arith.constant 0 : index
    %0 = vector.load %arg2[%c0, %c0_0] : memref<64x8xf32, #tpu.memory_space<vmem>>, vector<64x8xf32>
    %c0_1 = arith.constant 0 : index
    %c0_2 = arith.constant 0 : index
    %1 = vector.load %arg1[%c0_1, %c0_2] : memref<8x128xf32, #tpu.memory_space<vmem>>, vector<8x128xf32>
    %cst = arith.constant dense<0.000000e+00> : vector<64x128xf32>
    %2 = tpu.matmul %0, %1, %cst {dimension_numbers = #tpu.dot_dimension_numbers<[1], [0], [0], [1], [0, 0, 1, 1], [], []>} : vector<64x8xf32>, vector<8x128xf32>, vector<64x128xf32> -> vector<64x128xf32>
    %c0_3 = arith.constant 0 : index
    %c0_4 = arith.constant 0 : index
    %3 = vector.load %arg3[%c0_3, %c0_4] : memref<64x1xf32, #tpu.memory_space<vmem>>, vector<64x1xf32>
    %4 = vector.broadcast %3 : vector<64x1xf32> to vector<64x128xf32>
    %5 = arith.addf %2, %4 : vector<64x128xf32>
    %cst_5 = arith.constant 0.000000e+00 : f32
    %6 = vector.broadcast %cst_5 : f32 to vector<64x128xf32>
    %7 = arith.maximumf %5, %6 : vector<64x128xf32>
    %c0_6 = arith.constant 0 : index
    %c0_7 = arith.constant 0 : index
    %8 = vector.load %arg4[%c0_6, %c0_7] : memref<1x64xf32, #tpu.memory_space<vmem>>, vector<1x64xf32>
    %cst_8 = arith.constant dense<0.000000e+00> : vector<1x128xf32>
    %9 = tpu.matmul %8, %7, %cst_8 {dimension_numbers = #tpu.dot_dimension_numbers<[1], [0], [0], [1], [0, 0, 1, 1], [], []>} : vector<1x64xf32>, vector<64x128xf32>, vector<1x128xf32> -> vector<1x128xf32>
    %c0_9 = arith.constant 0 : index
    %c0_10 = arith.constant 0 : index
    %10 = vector.load %arg5[%c0_9, %c0_10] : memref<1x1xf32, #tpu.memory_space<vmem>>, vector<1x1xf32>
    %11 = vector.broadcast %10 : vector<1x1xf32> to vector<1x128xf32>
    %12 = arith.addf %9, %11 : vector<1x128xf32>
    %c0_11 = arith.constant 0 : index
    %c0_12 = arith.constant 0 : index
    %13 = vector.load %arg6[%c0_11, %c0_12] : memref<1x128xf32, #tpu.memory_space<vmem>>, vector<1x128xf32>
    tpu.vector_store %arg6[%c0_11, %c0_12], %12 {strides = array<i32>} : memref<1x128xf32, #tpu.memory_space<vmem>>, vector<1x128xf32>,
    return
  }
  func.func @transform_0(%arg0: i32) -> (i32, i32) {
    %c0_i32 = arith.constant 0 : i32
    %c0_i32_0 = arith.constant 0 : i32
    return %c0_i32, %arg0 : i32, i32
  }
  func.func @transform_1(%arg0: i32) -> (i32, i32) {
    %c0_i32 = arith.constant 0 : i32
    %c0_i32_0 = arith.constant 0 : i32
    %c0_i32_1 = arith.constant 0 : i32
    return %c0_i32, %c0_i32_0 : i32, i32
  }
  func.func @transform_2(%arg0: i32) -> (i32, i32) {
    %c0_i32 = arith.constant 0 : i32
    %c0_i32_0 = arith.constant 0 : i32
    %c0_i32_1 = arith.constant 0 : i32
    return %c0_i32, %c0_i32_0 : i32, i32
  }
  func.func @transform_3(%arg0: i32) -> (i32, i32) {
    %c0_i32 = arith.constant 0 : i32
    %c0_i32_0 = arith.constant 0 : i32
    %c0_i32_1 = arith.constant 0 : i32
    return %c0_i32, %c0_i32_0 : i32, i32
  }
  func.func @transform_4(%arg0: i32) -> (i32, i32) {
    %c0_i32 = arith.constant 0 : i32
    %c0_i32_0 = arith.constant 0 : i32
    %c0_i32_1 = arith.constant 0 : i32
    return %c0_i32, %c0_i32_0 : i32, i32
  }
  func.func @transform_5(%arg0: i32) -> (i32, i32) {
    %c0_i32 = arith.constant 0 : i32
    %c0_i32_0 = arith.constant 0 : i32
    return %c0_i32, %arg0 : i32, i32
  }
}

</mosaic_0001>

<bundles_post_ra>
// kernel: tpu_custom_call.1
= control target key start
LH: loop header
LB: loop body
LE: loop exit
PB: predicated region body
PF: predicated region fallthrough
CT: control target
= control target key end

     0   :  { %s533_s0 = inlined_call_operand.vmem [shape: f32[8,128], index: 0, kind: input, shape index: {}]   ;;  %s534_s1 = inlined_call_operand.vmem [shape: f32[64,8], index: 1, kind: input, shape index: {}]   ;;  %s535_s2 = inlined_call_operand.vmem [shape: f32[64,1], index: 2, kind: input, shape index: {}]   ;;  %s536_s3 = inlined_call_operand.vmem [shape: f32[1,64], index: 3, kind: input, shape index: {}]   ;;  %s537_s4 = inlined_call_operand.<no memory space> [shape: f32[1,1], index: 4, kind: input, shape index: {}]   ;;  %s538_s5 = inlined_call_operand.hbm [shape: f32[1,128], index: 5, kind: output, shape index: {}]  }
   0x1   :  { %v10_v0 = vstv %s537_s4 }
   0x2   :  { %11 = vst [vmem:[#allocation2] sm:$0x1] %v10_v0 }
   0x3   :  { %v31_v1 = vld [vmem:[%s533_s0] sm:$0xff]  ;;  %vm80_vm0 = vcmask 64512   ;;  %v24_v3 = vld [vmem:[%s534_s1 + $0x8] sm:$0xff]  ;;  %v25_v4 = vld [vmem:[%s534_s1 + $0x10] sm:$0xff]  ;;  %v421_v5 = vmov 0  }
   0x4   :  { %v23_v2 = vld [vmem:[%s534_s1] sm:$0xff]  ;;  %345 = vmatprep.subr.mxu0 %v31_v1  ;;  %395 = vset.pattern.permute.xlu0 %v421_v5  ;;  %v34_v7 = vld [vmem:[%s535_s2 + $0x10] sm:$0xff]  ;;  %v26_v8 = vld [vmem:[%s534_s1 + $0x18] sm:$0xff] }
   0x5   :  { %347 = vmatprep.mubr.msk.f32.mxu0 %vm80_vm0, %v23_v2  ;;  %346 = vmatpush3.msra.mxu0 %v31_v1  ;;  %v32_v6 = vld [vmem:[%s535_s2] sm:$0xff]  ;;  %v33_v10 = vld [vmem:[%s535_s2 + $0x8] sm:$0xff]  ;;  %v35_v11 = vld [vmem:[%s535_s2 + $0x18] sm:$0xff] }
   0x6   :  { %348 = vmatmul.mubr.msk.f32.vlgmr.msra.gmra.mrb[0].mxu0 %vm80_vm0, %v24_v3  ;;  %396 = vset.pattern.permute.xlu1 %v421_v5  ;;  %v27_v9 = vld [vmem:[%s534_s1 + $0x20] sm:$0xff] }
   0x7   :  { %350 = vmatprep.mubr.msk.f32.mxu0 %vm80_vm0, %v25_v4  ;;  %42 = vperm.xlu0 %395, %v32_v6  }
   0x8   :  { %52 = vperm.xlu1 %396, %v34_v7  }
   0x9   :  { %12 = vsyncpa [#allocation4], 0  ;;  %v28_v12 = vld [vmem:[%s534_s1 + $0x28] sm:$0xff]  ;;  %v29_v13 = vld [vmem:[%s534_s1 + $0x30] sm:$0xff]  ;;  %v422_v20 = vmov 0.0|0.0   ;;  %vm423_vm1 = vmmov 0   ;;  %v225_v59 = vlaneseq }
   0xa   :  { %351 = vmatmul.mubr.msk.f32.gmra.mrb[2].mxu0 %vm80_vm0, %v26_v8  ;;  %v36_v14 = vld [vmem:[%s535_s2 + $0x20] sm:$0xff]  ;;  %v37_v15 = vld [vmem:[%s535_s2 + $0x28] sm:$0xff]  ;;  %v30_v16 = vld [vmem:[%s534_s1 + $0x38] sm:$0xff]  ;;  %378 = vmatprep.subr.bf16.mxu1 %v422_v20  ;;  %v424_v21 = vmov 0.0   ;;  %vm229_vm2 = vcmask 523264   ;;  %s425_s27 = smov [#allocation3]  }
   0xb   :  { %353 = vmatprep.mubr.msk.f32.mxu0 %vm80_vm0, %v27_v9  ;;  %47 = vperm.xlu0 %395, %v33_v10   ;;  %v38_v17 = vld [vmem:[%s535_s2 + $0x30] sm:$0xff]  ;;  %v39_v18 = vld [vmem:[%s535_s2 + $0x38] sm:$0xff]  ;;  %v219_v19 = vld [vmem:[#allocation2] sm:$0x1]  ;;  %v226_v60 = vshrl.u32 %v225_v59, 7  ;;  %s310_s0 = sshll.u32 %s425_s27, 4  ;;  %s311_s0 = int_to_ptr.vmem [resolvable:$true] %s310_s0 }
   0xc   :  { %57 = vperm.xlu1 %396, %v35_v11   ;;  %375 = vmatprep.mubr.msk.f32.mxu1 %vm423_vm1, %v424_v21  ;;  %v218_v58 = vld [vmem:[%s536_s3] sm:$0x1]  ;;  %s397_s4 = scalar_lea.vmem %s311_s0, 16  ;;  %s401_s28 = scalar_lea.vmem %s311_s0, 32 }
   0xd   :  { %v227_v61 = vsub.s32 0, %v226_v60  ;;  %p398_p0 = scmp.ne.s32.totalorder %s311_s0, %s397_s4  ;;  %p402_p1 = scmp.lt.s32.totalorder %s311_s0, %s311_s0 }
   0xe   :  { %354 = vmatmul.mubr.msk.f32.gmra.mrb[4].mxu0 %vm80_vm0, %v28_v12  ;;  %p403_p2 = scmp.lt.s32.totalorder %s401_s28, %s397_s4 }
   0xf   :  { %356 = vmatprep.mubr.msk.f32.mxu0 %vm80_vm0, %v29_v13  ;;  %62 = vperm.xlu0 %395, %v36_v14  }
  0x10   :  { %67 = vperm.xlu1 %396, %v37_v15   ;;  %p404_p3 = por %p403_p2, %p402_p1 }
  0x12   :  { %357 = vmatmul.mubr.msk.f32.gmra.mrb[6].mxu0 %vm80_vm0, %v30_v16  ;;  %p405_p4 = pnand %p404_p3, %p398_p0 }
  0x13   :  { %72 = vperm.xlu0 %395, %v38_v17  }
  0x14   :  { %77 = vperm.xlu1 %396, %v39_v18  }
  0x17   :  { %222 = vperm.xlu0 %395, %v219_v19  }
  0x86   :  { %v43_v22 = vpop.permute.xlu0 %42 }
  0x87   :  { %v53_v23 = vpop.permute.xlu1 %52 }
  0x8a   :  { %v48_v24 = vpop.permute.xlu0 %47 }
  0x8b   :  { %v58_v25 = vpop.permute.xlu1 %57 }
  0x8e   :  { %v63_v38 = vpop.permute.xlu0 %62 }
  0x8f   :  { %v68_v35 = vpop.permute.xlu1 %67 }
  0x92   :  { %v73_v50 = vpop.permute.xlu0 %72 }
  0x93   :  { %v78_v47 = vpop.permute.xlu1 %77 }
  0x96   :  { %v223_v62 = vpop.permute.xlu0 %222 }
  0x97   :  { %v228_v63 = vrot.slane %v223_v62, %v227_v61 }
  0xd9   :  { %v349_v26 = vpop.f32.mrb[0].mxu0 }
  0xda   :  { %v177_v27 = vadd.f32 %v349_v26, %v48_v24  ;;  %v171_v28 = vpop.f32.mrb[1].mxu0 }
  0xdb   :  { %v172_v29 = vadd.f32 %v171_v28, %v43_v22 }
  0xdc   :  { %v211_v30 = vmax.f32 %v177_v27, 0.0 }
  0xdd   :  { %v210_v31 = vmax.f32 %v172_v29, 0.0  ;;  %v352_v32 = vpop.f32.mrb[2].mxu0 }
  0xde   :  { %v187_v33 = vadd.f32 %v352_v32, %v58_v25  ;;  %v181_v34 = vpop.f32.mrb[3].mxu0 }
  0xdf   :  { %v182_v36 = vadd.f32 %v181_v34, %v53_v23  ;;  %v379_v37 = vpack.c.bf16 %v211_v30, %v210_v31 }
  0xe0   :  { %v213_v39 = vmax.f32 %v187_v33, 0.0 }
  0xe1   :  { %v212_v40 = vmax.f32 %v182_v36, 0.0  ;;  %v355_v41 = vpop.f32.mrb[4].mxu0  ;;  %380 = vmatpush3.bf16.msra.mxu1 %v379_v37 }
  0xe2   :  { %v197_v42 = vadd.f32 %v355_v41, %v68_v35  ;;  %v191_v43 = vpop.f32.mrb[5].mxu0  ;;  %381 = vmatprep.subr.bf16.mxu1 %v422_v20 }
  0xe3   :  { %v382_v44 = vpack.c.bf16 %v213_v39, %v212_v40  ;;  %v192_v45 = vadd.f32 %v191_v43, %v63_v38 }
  0xe4   :  { %v215_v46 = vmax.f32 %v197_v42, 0.0 }
  0xe5   :  { %v214_v48 = vmax.f32 %v192_v45, 0.0  ;;  %v358_v49 = vpop.f32.mrb[6].mxu0  ;;  %383 = vmatpush3.bf16.msra.mxu1 %v382_v44 }
  0xe6   :  { %v207_v51 = vadd.f32 %v358_v49, %v78_v47  ;;  %v201_v52 = vpop.f32.mrb[7].mxu0  ;;  %384 = vmatprep.subr.bf16.mxu1 %v422_v20 }
  0xe7   :  { %v385_v53 = vpack.c.bf16 %v215_v46, %v214_v48  ;;  %v202_v54 = vadd.f32 %v201_v52, %v73_v50 }
  0xe8   :  { %v217_v55 = vmax.f32 %v207_v51, 0.0 }
  0xe9   :  { %v216_v56 = vmax.f32 %v202_v54, 0.0  ;;  %386 = vmatpush3.bf16.msra.mxu1 %v385_v53 }
  0xea   :  { %387 = vmatprep.subr.bf16.mxu1 %v422_v20 }
  0xeb   :  { %v388_v57 = vpack.c.bf16 %v217_v55, %v216_v56 }
  0xed   :  { %389 = vmatpush3.bf16.msra.mxu1 %v388_v57 }
  0xf0   :  { %376 = vmatmul.mubr.msk.f32.vlgmr.msra.gmra.mrb[0].mxu1 %vm229_vm2, %v218_v58 }
 0x1c3   :  { %v299_v0 = vpop.f32.mrb[0].mxu1 }
 0x1c4   :  { %v300_v1 = vadd.f32 %v299_v0, %v228_v63  ;;  %v377_v2 = vpop.f32.mrb[1].mxu1 }
 0x1c6   :  { %303 = vst [vmem:[#allocation3] sm:$0x1] %v300_v1 }
 0x1c7   :  { %408 = shalt.err (!%p405_p4)
}
 0x1c8   :  { %s409_s30 = scalar_lea.hbm %s538_s5, 16 }
 0x1c9   :  { %p410_p5 = scmp.ne.s32.totalorder %s538_s5, %s409_s30  ;;  %p413_p6 = scmp.lt.u32.totalorder %s409_s30, %s538_s5 }
 0x1cb   :  { %p415_p7 = pnand %p413_p6, %p410_p5 }
 0x1cd   :  { %418 = shalt.err (!%p415_p7)
}
 0x1ce   :  { %313 = dma.vmem_to_hbm [thread:$0]  %s311_s0, 16, %s538_s5, [#allocation4]  }
 0x1cf   :  { %419 = dma.done.wait [#allocation4], 16  }
 0x1d0   :  { %420 = vsyncadd [#allocation4], 4294967280 }
 0x1d1   :  { %317 = vsyncpa [#allocation4], 1 }

</bundles_post_ra>
